<compile_context>
chip_gen: v6e
topology: v6e:2x2x1
jax: 0.10.0
libtpu: 0.0.40
codegen_flags: <defaults>
</compile_context>

<pallas_src>
import functools

import jax
import jax.numpy as jnp
from jax import lax
from jax.experimental import pallas as pl
from jax.experimental.pallas import tpu as pltpu

_LANE = 128


def _round_up(x, m):
    return ((x + m - 1) // m) * m


def _sublane_unit(dtype):
    """Native sublane granularity: 8 rows (4-byte), 16 (2-byte), 32 (1-byte)."""
    itemsize = jnp.dtype(dtype).itemsize
    if itemsize >= 4:
        return 8
    return 32 // itemsize


def _generation_params():
    """(target_block_bytes, vmem_limit_bytes, assume_two_cores) per TPU gen."""
    vmem_cap = None
    try:
        vmem_cap = int(pltpu.get_tpu_info().vmem_capacity_bytes)
    except Exception:
        vmem_cap = None
    if vmem_cap is not None and vmem_cap <= 64 * 1024 * 1024:
        # v7x-class TensorCore: 64 MiB physical VMEM, 3.2 TB/s HBM, 2 TCs.
        return 8 * 1024 * 1024, 48 * 1024 * 1024, True
    if vmem_cap is not None:
        # v5e / v6e: 128 MiB physical VMEM (scoped default 16/32 MiB -> raise).
        return 6 * 1024 * 1024, 64 * 1024 * 1024, False
    # Unknown generation: settings that are safe on every generation.
    return 6 * 1024 * 1024, 48 * 1024 * 1024, True


def _largest_divisor_tile(dim, unit, cap):
    """Largest divisor of `dim` that is a multiple of `unit` and <= cap."""
    best = None
    t = unit
    limit = min(dim, max(unit, cap))
    while t <= limit:
        if dim % t == 0:
            best = t
        t += unit
    return best


def _bounded_tile(dim, unit, cap):
    """Multiple-of-`unit` tile <= min(dim, cap) (full dim when dim <= unit)."""
    if dim <= unit:
        return dim
    cap = max(unit, cap)
    return (min(dim, cap) // unit) * unit


def _pick_tile(dim, unit, cap):
    """Prefer a tile dividing `dim` (no tail block); else a bounded tile with a
    partial tail block. Returns (tile, has_tail)."""
    bounded = _bounded_tile(dim, unit, cap)
    divisor = _largest_divisor_tile(dim, unit, cap)
    if divisor is not None and 2 * divisor >= bounded:
        return divisor, False
    return bounded, (dim % bounded != 0)


def _mean_axis_kernel(x_ref, o_ref, *scratch, inv_l, l_total, tl, mask_l):
    """Reduce the middle (sublane) axis of a (t_m, tl, t_d) tile."""
    l_idx = pl.program_id(2)
    acc_ref = scratch[0] if scratch else o_ref

    @pl.when(l_idx == 0)
    def _init():
        acc_ref[...] = jnp.zeros_like(acc_ref)

    vals = x_ref[...]
    if mask_l:  # trace-time flag: zero the padded tail rows of the L axis
        l_ids = l_idx * tl + lax.broadcasted_iota(jnp.int32, vals.shape, 1)
        vals = jnp.where(l_ids < l_total, vals, jnp.zeros_like(vals))
    acc_ref[...] += jnp.sum(vals, axis=1, dtype=jnp.float32)

    @pl.when(l_idx == pl.num_programs(2) - 1)
    def _finalize():
        o_ref[...] = (acc_ref[...] * inv_l).astype(o_ref.dtype)


def _mean_lane_kernel(x_ref, o_ref, *scratch, inv_l, l_total, tl, mask_l):
    """Reduce the lane (last) axis of a (t_m, tl) tile; output (t_m, 1)."""
    l_idx = pl.program_id(1)
    acc_ref = scratch[0] if scratch else o_ref

    @pl.when(l_idx == 0)
    def _init():
        acc_ref[...] = jnp.zeros_like(acc_ref)

    vals = x_ref[...]
    if mask_l:
        l_ids = l_idx * tl + lax.broadcasted_iota(jnp.int32, vals.shape, 1)
        vals = jnp.where(l_ids < l_total, vals, jnp.zeros_like(vals))
    acc_ref[...] += jnp.sum(vals, axis=1, keepdims=True, dtype=jnp.float32)

    @pl.when(l_idx == pl.num_programs(1) - 1)
    def _finalize():
        o_ref[...] = (acc_ref[...] * inv_l).astype(o_ref.dtype)


def lambda_mean_dim2(x, *, target_block_bytes=None, vmem_limit_bytes=None):
    """Equivalent of torch.mean(x, dim=2) for any input with ndim >= 3."""
    assert x.ndim >= 3, "torch.mean(x, dim=2) requires ndim >= 3"
    shape = x.shape
    L = int(shape[2])
    M = int(shape[0]) * int(shape[1])
    D = 1
    for s in shape[3:]:
        D *= int(s)
    out_shape_full = tuple(shape[:2]) + tuple(shape[3:])

    gen_block, gen_vmem, two_cores = _generation_params()
    if target_block_bytes is None:
        target_block_bytes = gen_block
    if vmem_limit_bytes is None:
        vmem_limit_bytes = gen_vmem

    itemsize = jnp.dtype(x.dtype).itemsize
    sub_unit = _sublane_unit(x.dtype)
    inv_l = 1.0 / float(L)
    # f32 accumulates directly into the resident output block (no scratch).
    use_out_acc = jnp.dtype(x.dtype) == jnp.dtype(jnp.float32)

    def _compiler(sem):
        return pltpu.CompilerParams(dimension_semantics=sem,
                                    vmem_limit_bytes=vmem_limit_bytes)

    if D == 1:
        # ndim == 3 (or trailing dims of size 1): reduce over the lane axis so
        # blocks stay lane-dense instead of wasting 127/128 lanes.
        xf = x.reshape(M, L)

        cap_l = max(_LANE, target_block_bytes // (sub_unit * itemsize))
        tl, mask_l = _pick_tile(L, _LANE, cap_l)
        cap_m = max(sub_unit,
                    target_block_bytes // (_round_up(tl, _LANE) * itemsize))
        t_m, _ = _pick_tile(M, sub_unit, cap_m)

        n_m, n_l = pl.cdiv(M, t_m), pl.cdiv(L, tl)
        if two_cores and n_m < 2 and M > sub_unit:
            half = _round_up(pl.cdiv(M, 2), sub_unit)
            if half < M:
                t_m = half
                n_m = pl.cdiv(M, t_m)

        kernel = functools.partial(_mean_lane_kernel, inv_l=inv_l, l_total=L,
                                   tl=tl, mask_l=mask_l)
        out_flat = pl.pallas_call(
            kernel,
            out_shape=jax.ShapeDtypeStruct((M, 1), x.dtype),
            grid=(n_m, n_l),
            in_specs=[pl.BlockSpec((t_m, tl), lambda m, l: (m, l))],
            out_specs=pl.BlockSpec((t_m, 1), lambda m, l: (m, 0)),
            scratch_shapes=([] if use_out_acc
                            else [pltpu.VMEM((t_m, 1), jnp.float32)]),
            compiler_params=_compiler(("parallel", "arbitrary")),
        )(xf)
        return out_flat.reshape(out_shape_full)

    xf = x.reshape(M, L, D)

    # ---- D (lane) tile: full D unless even a minimal block would blow the
    #      budget; byte accounting uses the lane-padded footprint. ----
    if D > _LANE and (_round_up(D, _LANE) * itemsize * sub_unit * sub_unit
                      > target_block_bytes):
        cap_d = max(_LANE,
                    target_block_bytes // (sub_unit * sub_unit * itemsize))
        t_d, _ = _pick_tile(D, _LANE, cap_d)
    else:
        t_d = D
    row_bytes = _round_up(t_d, _LANE) * itemsize     # padded (1 m, 1 l) row

    # ---- L (sublane, reduced) tile: masked cdiv tail when L % unit != 0. ----
    cap_l = max(sub_unit, target_block_bytes // (sub_unit * row_bytes))
    tl, mask_l = _pick_tile(L, sub_unit, cap_l)

    # ---- M tile fills the rest of the per-step block budget. ----
    cap_m = max(sub_unit,
                target_block_bytes // (_round_up(tl, sub_unit) * row_bytes))
    t_m, _ = _pick_tile(M, sub_unit, cap_m)

    n_m, n_d, n_l = pl.cdiv(M, t_m), pl.cdiv(D, t_d), pl.cdiv(L, tl)
    # v7x: guarantee >= 2 parallel grid steps so both TensorCores get work.
    if two_cores and n_m * n_d < 2 and M > sub_unit:
        half = _round_up(pl.cdiv(M, 2), sub_unit)
        if half < M:
            t_m = half
            n_m = pl.cdiv(M, t_m)

    kernel = functools.partial(_mean_axis_kernel, inv_l=inv_l, l_total=L,
                               tl=tl, mask_l=mask_l)
    out_flat = pl.pallas_call(
        kernel,
        out_shape=jax.ShapeDtypeStruct((M, D), x.dtype),
        grid=(n_m, n_d, n_l),
        in_specs=[pl.BlockSpec((t_m, tl, t_d), lambda m, d, l: (m, l, d))],
        out_specs=pl.BlockSpec((t_m, t_d), lambda m, d, l: (m, d)),
        scratch_shapes=([] if use_out_acc
                        else [pltpu.VMEM((t_m, t_d), jnp.float32)]),
        compiler_params=_compiler(("parallel", "parallel", "arbitrary")),
    )(xf)
    return out_flat.reshape(out_shape_full)


if __name__ == "__main__":
    key = jax.random.PRNGKey(0)
    k1, k2, k3 = jax.random.split(key, 3)

    # 4-D input (B, C, L, D): the common Lambda use case.
    x = jax.random.normal(k1, (2, 4, 16, 32), dtype=jnp.float32)
    ref = jnp.mean(x, axis=2)
    out = jax.block_until_ready(lambda_mean_dim2(x))
    assert out.shape == ref.shape, (out.shape, ref.shape)
    assert jnp.allclose(out, ref, atol=1e-5, rtol=1e-5)

    # Tiny block budget forces a multi-step L reduction (init/accum/finalize).
    out_small = jax.block_until_ready(
        lambda_mean_dim2(x, target_block_bytes=4096))
    assert jnp.allclose(out_small, ref, atol=1e-5, rtol=1e-5)

    # L not a multiple of the sublane unit -> masked cdiv-grid tail tile.
    x_odd = jax.random.normal(k2, (2, 4, 10, 32), dtype=jnp.float32)
    ref_odd = jnp.mean(x_odd, axis=2)
    out_odd = jax.block_until_ready(lambda_mean_dim2(x_odd))
    assert jnp.allclose(out_odd, ref_odd, atol=1e-5, rtol=1e-5)

    # 3-D input -> lane-dense (M, L) reduction path.
    x3 = jax.random.normal(k3, (2, 4, 16), dtype=jnp.float32)
    ref3 = jnp.mean(x3, axis=2)
    out3 = jax.block_until_ready(lambda_mean_dim2(x3))
    assert out3.shape == ref3.shape
    assert jnp.allclose(out3, ref3, atol=1e-5, rtol=1e-5)

    # bf16 input -> f32 scratch accumulator path + dtype-aware sublane unit.
    xb = x.astype(jnp.bfloat16)
    refb = jnp.mean(xb.astype(jnp.float32), axis=2)
    outb = jax.block_until_ready(lambda_mean_dim2(xb)).astype(jnp.float32)
    assert jnp.allclose(outb, refb, atol=2e-2, rtol=2e-2)

    print("KERNEL_OK")
</pallas_src>

<mosaic_0001>
module attributes {stable_mosaic.version = 11 : i64} {
  func.func @_mean_axis_kernel(%arg0: i32, %arg1: i32, %arg2: i32, %arg3: memref<8x16x32xf32, #tpu.memory_space<vmem>>, %arg4: memref<8x32xf32, #tpu.memory_space<vmem>>) attributes {dimension_semantics = [#tpu.dimension_semantics<parallel>, #tpu.dimension_semantics<parallel>, #tpu.dimension_semantics<arbitrary>], iteration_bounds = array<i64: 1, 1, 1>, scalar_prefetch = 0 : i64, scratch_operands = 0 : i64, tpu.core_type = #tpu.core_type<tc>, window_params = [{transform_indices = @transform_0, window_bounds = array<i64: 8, 16, 32>}, {transform_indices = @transform_1, window_bounds = array<i64: 8, 32>}]} {
    %c0_i32 = arith.constant 0 : i32
    %0 = arith.cmpi eq, %arg2, %c0_i32 : i32
    %1 = arith.extui %0 : i1 to i32
    %c0_i32_0 = arith.constant 0 : i32
    %2 = arith.cmpi ne, %1, %c0_i32_0 : i32
    scf.if %2 {
      %cst_9 = arith.constant 0.000000e+00 : f32
      %11 = vector.broadcast %cst_9 : f32 to vector<8x32xf32>
      %c0_10 = arith.constant 0 : index
      %c0_11 = arith.constant 0 : index
      %12 = vector.load %arg4[%c0_10, %c0_11] : memref<8x32xf32, #tpu.memory_space<vmem>>, vector<8x32xf32>
      tpu.vector_store %arg4[%c0_10, %c0_11], %11 {strides = array<i32>} : memref<8x32xf32, #tpu.memory_space<vmem>>, vector<8x32xf32>,
    } else {
    }
    %c0 = arith.constant 0 : index
    %c0_1 = arith.constant 0 : index
    %c0_2 = arith.constant 0 : index
    %3 = vector.load %arg3[%c0, %c0_1, %c0_2] : memref<8x16x32xf32, #tpu.memory_space<vmem>>, vector<8x16x32xf32>
    %c0_3 = arith.constant 0 : index
    %c0_4 = arith.constant 0 : index
    %4 = vector.load %arg4[%c0_3, %c0_4] : memref<8x32xf32, #tpu.memory_space<vmem>>, vector<8x32xf32>
    %cst = arith.constant dense<0.000000e+00> : vector<8x32xf32>
    %5 = vector.multi_reduction <add>, %3, %cst [1] : vector<8x16x32xf32> to vector<8x32xf32>
    %6 = arith.addf %4, %5 : vector<8x32xf32>
    %c0_5 = arith.constant 0 : index
    %c0_6 = arith.constant 0 : index
    %7 = vector.load %arg4[%c0_5, %c0_6] : memref<8x32xf32, #tpu.memory_space<vmem>>, vector<8x32xf32>
    tpu.vector_store %arg4[%c0_5, %c0_6], %6 {strides = array<i32>} : memref<8x32xf32, #tpu.memory_space<vmem>>, vector<8x32xf32>,
    %c0_i32_7 = arith.constant 0 : i32
    %8 = arith.cmpi eq, %arg2, %c0_i32_7 : i32
    %9 = arith.extui %8 : i1 to i32
    %c0_i32_8 = arith.constant 0 : i32
    %10 = arith.cmpi ne, %9, %c0_i32_8 : i32
    scf.if %10 {
      %c0_9 = arith.constant 0 : index
      %c0_10 = arith.constant 0 : index
      %11 = vector.load %arg4[%c0_9, %c0_10] : memref<8x32xf32, #tpu.memory_space<vmem>>, vector<8x32xf32>
      %cst_11 = arith.constant 6.250000e-02 : f32
      %12 = vector.broadcast %cst_11 : f32 to vector<8x32xf32>
      %13 = arith.mulf %11, %12 : vector<8x32xf32>
      %c0_12 = arith.constant 0 : index
      %c0_13 = arith.constant 0 : index
      %14 = vector.load %arg4[%c0_12, %c0_13] : memref<8x32xf32, #tpu.memory_space<vmem>>, vector<8x32xf32>
      tpu.vector_store %arg4[%c0_12, %c0_13], %13 {strides = array<i32>} : memref<8x32xf32, #tpu.memory_space<vmem>>, vector<8x32xf32>,
    } else {
    }
    return
  }
  func.func @transform_0(%arg0: i32, %arg1: i32, %arg2: i32) -> (i32, i32, i32) {
    %c0_i32 = arith.constant 0 : i32
    return %arg0, %arg2, %arg1 : i32, i32, i32
  }
  func.func @transform_1(%arg0: i32, %arg1: i32, %arg2: i32) -> (i32, i32) {
    %c0_i32 = arith.constant 0 : i32
    return %arg0, %arg1 : i32, i32
  }
}

</mosaic_0001>

<bundles_post_ra>
// kernel: tpu_custom_call.1
= control target key start
LH: loop header
LB: loop body
LE: loop exit
PB: predicated region body
PF: predicated region fallthrough
CT: control target
= control target key end

     0   :  { %6 = vsyncpa [#allocation3], 0  ;;  %s256_s0 = inlined_call_operand.hbm [shape: f32[8,16,32], index: 0, kind: input, shape index: {}]   ;;  %s257_s1 = inlined_call_operand.hbm [shape: f32[8,32], index: 1, kind: output, shape index: {}]  }
   0x1   :  { %7 = vsyncpa [#allocation4], 0  ;;  %s214_s6 = smov [#allocation2]  }
   0x2   :  { %s13_s7 = sshll.u32 %s214_s6, 4  ;;  %s14_s7 = int_to_ptr.vmem [resolvable:$true] %s13_s7 }
   0x3   :  { %s178_s8 = scalar_lea.vmem %s14_s7, 2048  ;;  %p183_p1 = scmp.lt.s32.totalorder %s14_s7, %s14_s7 }
   0x4   :  { %p179_p0 = scmp.ne.s32.totalorder %s14_s7, %s178_s8  ;;  %p184_p2 = scmp.lt.s32.totalorder %s178_s8, %s178_s8 }
   0x6   :  { %p185_p3 = por %p184_p2, %p183_p1 }
   0x8   :  { %p186_p4 = pnand %p185_p3, %p179_p0 }
   0xa   :  { %189 = shalt.err (!%p186_p4)
}
   0xb   :  { %s215_s9 = smov 128   ;;  %s216_s10 = smov 8  }
   0xc   :  { %19 = dma.hbm_to_vmem [thread:$0]  %s256_s0, 2048, %s14_s7, [#allocation3], %s215_s9, %s215_s9, %s216_s10  }
   0xd   :  { %210 = dma.done.wait [#allocation3], 2048  }
   0xe   :  { %211 = vsyncadd [#allocation3], 4294965248  ;;  %vm27_vm0 = vcmask 261120   ;;  %v217_v0 = vmov 0.0   ;;  %v29_v1 = vld [vmem:[#allocation2] sm:$0xff]  ;;  %v30_v2 = vld [vmem:[#allocation2 + $0x8] sm:$0xff] }
   0xf   :  { %28 = vst.msk [vmem:[#allocation5] sm:$0xff] %vm27_vm0, %v217_v0  ;;  %v31_v3 = vld [vmem:[#allocation2 + $0x10] sm:$0xff]  ;;  %v32_v4 = vld [vmem:[#allocation2 + $0x18] sm:$0xff]  ;;  %v33_v5 = vld [vmem:[#allocation2 + $0x20] sm:$0xff]  ;;  %v47_v7 = vsel %vm27_vm0, %v29_v1, 0.0  ;;  %v48_v8 = vsel %vm27_vm0, %v30_v2, 0.0 }
  0x10   :  { %v34_v6 = vld [vmem:[#allocation2 + $0x28] sm:$0xff]  ;;  %v56_v9 = vsel %vm27_vm0, %v31_v3, 0.0  ;;  %v35_v10 = vld [vmem:[#allocation2 + $0x30] sm:$0xff]  ;;  %v36_v11 = vld [vmem:[#allocation2 + $0x38] sm:$0xff]  ;;  %v49_v13 = vadd.f32 %v48_v8, %v47_v7  ;;  %v57_v14 = vsel %vm27_vm0, %v32_v4, 0.0  ;;  %v65_v15 = vsel %vm27_vm0, %v33_v5, 0.0 }
  0x11   :  { %v37_v12 = vld [vmem:[#allocation2 + $0x40] sm:$0xff]  ;;  %v66_v16 = vsel %vm27_vm0, %v34_v6, 0.0  ;;  %v38_v17 = vld [vmem:[#allocation2 + $0x48] sm:$0xff]  ;;  %v39_v18 = vld [vmem:[#allocation2 + $0x50] sm:$0xff]  ;;  %v58_v20 = vadd.f32 %v57_v14, %v56_v9  ;;  %v74_v22 = vsel %vm27_vm0, %v35_v10, 0.0  ;;  %v75_v23 = vsel %vm27_vm0, %v36_v11, 0.0 }
  0x12   :  { %v40_v19 = vld [vmem:[#allocation2 + $0x58] sm:$0xff]  ;;  %v67_v21 = vadd.f32 %v66_v16, %v65_v15  ;;  %v41_v24 = vld [vmem:[#allocation2 + $0x60] sm:$0xff]  ;;  %v50_v25 = vrot.slane %v49_v13, 4  ;;  %v76_v26 = vadd.f32 %v75_v23, %v74_v22  ;;  %v83_v27 = vsel %vm27_vm0, %v37_v12, 0.0  ;;  %v42_v29 = vld [vmem:[#allocation2 + $0x68] sm:$0xff]  ;;  %s218_s0 = smov [#allocation5]  }
  0x13   :  { %v84_v28 = vsel %vm27_vm0, %v38_v17, 0.0  ;;  %v43_v30 = vld [vmem:[#allocation2 + $0x70] sm:$0xff]  ;;  %v59_v31 = vrot.slane %v58_v20, 4  ;;  %v92_v34 = vsel %vm27_vm0, %v39_v18, 0.0  ;;  %v93_v37 = vsel %vm27_vm0, %v40_v19, 0.0  ;;  %v44_v39 = vld [vmem:[#allocation2 + $0x78] sm:$0xff] }
  0x14   :  { %v68_v32 = vrot.slane %v67_v21, 4  ;;  %v85_v33 = vadd.f32 %v84_v28, %v83_v27  ;;  %v51_v35 = vadd.f32 %v50_v25, %v49_v13  ;;  %v77_v36 = vrot.slane %v76_v26, 4  ;;  %s156_s13 = sshll.u32 %s218_s0, 4  ;;  %s157_s13 = int_to_ptr.vmem [resolvable:$true] %s156_s13 }
  0x15   :  { %v101_v38 = vsel %vm27_vm0, %v41_v24, 0.0  ;;  %vm127_vm1 = vcmask 1041409   ;;  %v60_v40 = vadd.f32 %v59_v31, %v58_v20  ;;  %v94_v43 = vadd.f32 %v93_v37, %v92_v34  ;;  %s190_s14 = scalar_lea.vmem %s157_s13, 128  ;;  %p195_p6 = scmp.lt.s32.totalorder %s157_s13, %s157_s13 }
  0x16   :  { %v69_v41 = vadd.f32 %v68_v32, %v67_v21  ;;  %v86_v42 = vrot.slane %v85_v33, 4  ;;  %vm129_vm2 = vcmask 1042434   ;;  %v52_v44 = vrot.slane %v51_v35, 2  ;;  %p191_p5 = scmp.ne.s32.totalorder %s157_s13, %s190_s14  ;;  %p196_p7 = scmp.lt.s32.totalorder %s190_s14, %s190_s14 }
  0x17   :  { %v78_v45 = vadd.f32 %v77_v36, %v76_v26  ;;  %v102_v46 = vsel %vm27_vm0, %v42_v29, 0.0  ;;  %v110_v47 = vsel %vm27_vm0, %v43_v30, 0.0  ;;  %v61_v48 = vrot.slane %v60_v40, 2  ;;  %v45_v29 = vld [vmem:[#allocation5] sm:$0xff] }
  0x18   :  { %v70_v49 = vrot.slane %v69_v41, 2  ;;  %v87_v50 = vadd.f32 %v86_v42, %v85_v33  ;;  %v95_v51 = vrot.slane %v94_v43, 4  ;;  %v53_v52 = vadd.f32 %v52_v44, %v51_v35  ;;  %p197_p8 = por %p196_p7, %p195_p6 }
  0x19   :  { %v79_v53 = vrot.slane %v78_v45, 2  ;;  %v103_v54 = vadd.f32 %v102_v46, %v101_v38  ;;  %v111_v55 = vsel %vm27_vm0, %v44_v39, 0.0  ;;  %v62_v56 = vadd.f32 %v61_v48, %v60_v40 }
  0x1a   :  { %v71_v57 = vadd.f32 %v70_v49, %v69_v41  ;;  %v88_v58 = vrot.slane %v87_v50, 2  ;;  %v96_v59 = vadd.f32 %v95_v51, %v94_v43  ;;  %v54_v60 = vrot.slane %v53_v52, 1  ;;  %p198_p9 = pnand %p197_p8, %p191_p5 }
  0x1b   :  { %v80_v61 = vadd.f32 %v79_v53, %v78_v45  ;;  %v104_v62 = vrot.slane %v103_v54, 4  ;;  %v112_v63 = vadd.f32 %v111_v55, %v110_v47  ;;  %v63_v0 = vrot.slane %v62_v56, 1 }
  0x1c   :  { %v72_v1 = vrot.slane %v71_v57, 1  ;;  %v89_v2 = vadd.f32 %v88_v58, %v87_v50  ;;  %v97_v3 = vrot.slane %v96_v59, 2  ;;  %v55_v4 = vadd.f32 %v54_v60, %v53_v52 }
  0x1d   :  { %v81_v5 = vrot.slane %v80_v61, 1  ;;  %v105_v6 = vadd.f32 %v104_v62, %v103_v54  ;;  %v113_v7 = vrot.slane %v112_v63, 4  ;;  %v64_v8 = vadd.f32 %v63_v0, %v62_v56 }
  0x1e   :  { %v73_v9 = vadd.f32 %v72_v1, %v71_v57  ;;  %v90_v10 = vrot.slane %v89_v2, 1  ;;  %v98_v11 = vadd.f32 %v97_v3, %v96_v59  ;;  %vm131_vm3 = vcmask 1043459  }
  0x1f   :  { %v82_v12 = vadd.f32 %v81_v5, %v80_v61  ;;  %v106_v13 = vrot.slane %v105_v6, 2  ;;  %v114_v14 = vadd.f32 %v113_v7, %v112_v63  ;;  %v128_v17 = vsel %vm127_vm1, %v64_v8, %v55_v4 }
  0x20   :  { %v91_v15 = vadd.f32 %v90_v10, %v89_v2  ;;  %v99_v16 = vrot.slane %v98_v11, 1  ;;  %vm133_vm4 = vcmask 1044484   ;;  %v130_v20 = vsel %vm129_vm2, %v73_v9, %v128_v17 }
  0x21   :  { %v107_v18 = vadd.f32 %v106_v13, %v105_v6  ;;  %v115_v19 = vrot.slane %v114_v14, 2  ;;  %vm135_vm5 = vcmask 1045509   ;;  %v132_v22 = vsel %vm131_vm3, %v82_v12, %v130_v20 }
  0x22   :  { %v100_v21 = vadd.f32 %v99_v16, %v98_v11  ;;  %v134_v25 = vsel %vm133_vm4, %v91_v15, %v132_v22  ;;  %vm137_vm6 = vcmask 1046534   ;;  %vm139_vm7 = vcmask 1047559  }
  0x23   :  { %v108_v23 = vrot.slane %v107_v18, 1  ;;  %v116_v24 = vadd.f32 %v115_v19, %v114_v14 }
  0x24   :  { %v136_v26 = vsel %vm135_vm5, %v100_v21, %v134_v25 }
  0x25   :  { %v109_v27 = vadd.f32 %v108_v23, %v107_v18  ;;  %v117_v28 = vrot.slane %v116_v24, 1 }
  0x27   :  { %v118_v30 = vadd.f32 %v117_v28, %v116_v24  ;;  %v138_v31 = vsel %vm137_vm6, %v109_v27, %v136_v26 }
  0x29   :  { %v140_v32 = vsel %vm139_vm7, %v118_v30, %v138_v31 }
  0x2a   :  { %v142_v33 = vadd.f32 %v140_v32, %v45_v29 }
  0x2c   :  { %143 = vst.msk [vmem:[#allocation5] sm:$0xff] %vm27_vm0, %v142_v33 }
  0x33   :  { %v147_v34 = vld [vmem:[#allocation5] sm:$0xff] }
  0x34   :  { %v148_v35 = vmul.f32 0.0625, %v147_v34 }
  0x36   :  { %149 = vst.msk [vmem:[#allocation5] sm:$0xff] %vm27_vm0, %v148_v35 }
  0x37   :  { %201 = shalt.err (!%p198_p9)
}
  0x38   :  { %159 = dma.vmem_to_hbm [thread:$0]  %s157_s13, 128, %s257_s1, [#allocation4]  }
  0x39   :  { %212 = dma.done.wait [#allocation4], 128  }
  0x3a   :  { %213 = vsyncadd [#allocation4], 4294967168 }
  0x3b   :  { %163 = vsyncpa [#allocation3], 1 }
  0x3c   :  { %164 = vsyncpa [#allocation4], 1 }

</bundles_post_ra>
